<compile_context>
chip_gen: v7x
topology: tpu7x:2x2x1
jax: 0.10.0
libtpu: 0.0.40
codegen_flags: <defaults>
</compile_context>

<pallas_src>
import functools

import jax
import jax.numpy as jnp
from jax.experimental import pallas as pl
from jax.experimental.pallas import tpu as pltpu


# ------------------------------ fused joint-loss kernel ------------------------------
def _joint_loss_kernel(x_ref, y_ref, logits_ref, labels_ref, out_ref, acc_ref,
                       *, n_imp, n_batch, n_classes, lam):
    i = pl.program_id(0)

    @pl.when(i == 0)
    def _init():
        acc_ref[...] = jnp.zeros_like(acc_ref)

    # ---- imputation MSE partial sum on this lane-dense [tile_rows, 128] tile ----
    # (zero padding applied identically to x and y -> contributes 0 to the sum)
    d = x_ref[...] - y_ref[...]
    dd = d * d
    # Fold sublane groups onto an (8,128) accumulator: VPU-only adds per step;
    # the cross-lane reduction is deferred to the finalize step.
    acc_ref[...] += jnp.sum(dd.reshape(-1, 8, 128), axis=0)

    @pl.when(i == pl.num_programs(0) - 1)
    def _finalize():
        imp = jnp.sum(acc_ref[...]) * jnp.float32(1.0 / n_imp)   # mean over true count

        # ---- cross entropy: mean_b( logsumexp(logits_b) - logits_b[label_b] ) ----
        logits = logits_ref[...]                                  # [B, C] f32
        m = jnp.max(logits, axis=-1, keepdims=True)               # [B, 1]
        lse = jnp.log(jnp.sum(jnp.exp(logits - m), axis=-1, keepdims=True)) + m

        cls_ids = jax.lax.broadcasted_iota(jnp.int32, (n_batch, n_classes), 1)
        onehot = cls_ids == labels_ref[...]                       # [B, C] via [B,1] bcast
        tgt = jnp.sum(jnp.where(onehot, logits, 0.0))
        ce = (jnp.sum(lse) - tgt) * jnp.float32(1.0 / n_batch)

        # ---- combine in-kernel ----
        total = jnp.float32(lam) * imp + ce
        out_ref[0] = total
        out_ref[1] = imp
        out_ref[2] = ce


# ------------------------------------ wrapper ----------------------------------------
def _round_up(x, m):
    return ((x + m - 1) // m) * m


def joint_loss_forward(x_imp, y_imp, x_ds, y_ds, _lambda=0.5, tile_rows=2048):
    """Returns (total_loss, imp_loss, ds_loss) matching the PyTorch joint_loss module
    with imp_ls_fn = nn.MSELoss() and ds_ls_fn = nn.CrossEntropyLoss()."""
    n_imp = int(x_imp.size)
    rows = (n_imp + 127) // 128
    tr = _round_up(min(int(tile_rows), _round_up(rows, 8)), 8)    # tile rows (mult of 8)
    num_tiles = (rows + tr - 1) // tr
    padded_rows = num_tiles * tr

    def lane_dense(a):
        """Flatten to f32, zero-pad, reshape to the lane-dense [padded_rows, 128] slab."""
        flat = a.reshape(-1).astype(jnp.float32)
        pad = padded_rows * 128 - flat.shape[0]
        if pad:
            flat = jnp.pad(flat, (0, pad))
        return flat.reshape(padded_rows, 128)

    x2d = lane_dense(x_imp)
    y2d = lane_dense(y_imp)

    B, C = x_ds.shape
    logits = x_ds.astype(jnp.float32)
    labels = y_ds.reshape(B, 1).astype(jnp.int32)

    kernel = functools.partial(
        _joint_loss_kernel,
        n_imp=n_imp, n_batch=int(B), n_classes=int(C), lam=float(_lambda),
    )

    out = pl.pallas_call(
        kernel,
        grid=(num_tiles,),
        out_shape=jax.ShapeDtypeStruct((3,), jnp.float32),
        in_specs=[
            pl.BlockSpec((tr, 128), lambda i: (i, 0)),     # x_imp slab (pipelined)
            pl.BlockSpec((tr, 128), lambda i: (i, 0)),     # y_imp slab (pipelined)
            pl.BlockSpec((B, C), lambda i: (0, 0)),        # logits (resident, fetched once)
            pl.BlockSpec((B, 1), lambda i: (0, 0)),        # labels column (resident)
        ],
        out_specs=pl.BlockSpec(memory_space=pltpu.MemorySpace.SMEM),
        scratch_shapes=[pltpu.VMEM((8, 128), jnp.float32)],  # vector accumulator
        compiler_params=pltpu.CompilerParams(
            dimension_semantics=("arbitrary",)),
    )(x2d, y2d, logits, labels)

    return out[0], out[1], out[2]


# -------------------------------------- demo ------------------------------------------
if __name__ == "__main__":
    key = jax.random.PRNGKey(0)
    k1, k2, k3, k4 = jax.random.split(key, 4)

    B, T, D = 2, 16, 64     # imputation output / target  -> 2048 elems = 16 rows
    C = 4                   # number of classes
    _lambda = 0.5

    x_imp = jax.random.normal(k1, (B, T, D), dtype=jnp.float32)
    y_imp = jax.random.normal(k2, (B, T, D), dtype=jnp.float32)
    x_ds = jax.random.normal(k3, (B, C), dtype=jnp.float32)
    y_ds = jax.random.randint(k4, (B,), 0, C, dtype=jnp.int32)

    # tile_rows=8 exercises the multi-step grid reduction (16 rows -> 2 grid steps).
    fwd = jax.jit(functools.partial(joint_loss_forward, _lambda=_lambda, tile_rows=8))
    total, imp, ds = jax.block_until_ready(fwd(x_imp, y_imp, x_ds, y_ds))

    # pure-JAX reference (torch MSELoss mean + torch CrossEntropyLoss mean)
    imp_ref = jnp.mean((x_imp - y_imp) ** 2)
    ds_ref = jnp.mean(
        jax.nn.logsumexp(x_ds, axis=-1)
        - jnp.take_along_axis(x_ds, y_ds[:, None], axis=-1)[:, 0]
    )
    total_ref = _lambda * imp_ref + ds_ref
    assert jnp.allclose(imp, imp_ref, atol=1e-5)
    assert jnp.allclose(ds, ds_ref, atol=1e-5)
    assert jnp.allclose(total, total_ref, atol=1e-5)

    print("KERNEL_OK")
</pallas_src>

<mosaic_0001>
module attributes {stable_mosaic.version = 11 : i64} {
  func.func @_joint_loss_kernel(%arg0: i32, %arg1: memref<8x128xf32, #tpu.memory_space<vmem>>, %arg2: memref<8x128xf32, #tpu.memory_space<vmem>>, %arg3: memref<2x4xf32, #tpu.memory_space<vmem>>, %arg4: memref<2x1xi32, #tpu.memory_space<vmem>>, %arg5: memref<3xf32, #tpu.memory_space<smem>>, %arg6: memref<8x128xf32, #tpu.memory_space<vmem>>) attributes {dimension_semantics = [#tpu.dimension_semantics<arbitrary>], iteration_bounds = array<i64: 2>, scalar_prefetch = 0 : i64, scratch_operands = 1 : i64, tpu.core_type = #tpu.core_type<tc>, window_params = [{transform_indices = @transform_0, window_bounds = array<i64: 8, 128>}, {transform_indices = @transform_1, window_bounds = array<i64: 8, 128>}, {pipeline_mode = #tpu.pipeline_mode<synchronous>, transform_indices = @transform_2, window_bounds = array<i64: 2, 4>}, {pipeline_mode = #tpu.pipeline_mode<synchronous>, transform_indices = @transform_3, window_bounds = array<i64: 2, 1>}, {transform_indices = @transform_4, window_bounds = array<i64: 3>}]} {
    %c0_i32 = arith.constant 0 : i32
    %0 = arith.cmpi eq, %arg0, %c0_i32 : i32
    %1 = arith.extui %0 : i1 to i32
    %c0_i32_0 = arith.constant 0 : i32
    %2 = arith.cmpi ne, %1, %c0_i32_0 : i32
    scf.if %2 {
      %cst_9 = arith.constant 0.000000e+00 : f32
      %15 = vector.broadcast %cst_9 : f32 to vector<8x128xf32>
      %c0_10 = arith.constant 0 : index
      %c0_11 = arith.constant 0 : index
      %16 = vector.load %arg6[%c0_10, %c0_11] : memref<8x128xf32, #tpu.memory_space<vmem>>, vector<8x128xf32>
      tpu.vector_store %arg6[%c0_10, %c0_11], %15 {strides = array<i32>} : memref<8x128xf32, #tpu.memory_space<vmem>>, vector<8x128xf32>,
    } else {
    }
    %c0 = arith.constant 0 : index
    %c0_1 = arith.constant 0 : index
    %3 = vector.load %arg1[%c0, %c0_1] : memref<8x128xf32, #tpu.memory_space<vmem>>, vector<8x128xf32>
    %c0_2 = arith.constant 0 : index
    %c0_3 = arith.constant 0 : index
    %4 = vector.load %arg2[%c0_2, %c0_3] : memref<8x128xf32, #tpu.memory_space<vmem>>, vector<8x128xf32>
    %5 = arith.subf %3, %4 : vector<8x128xf32>
    %6 = arith.mulf %5, %5 : vector<8x128xf32>
    %c0_4 = arith.constant 0 : index
    %c0_5 = arith.constant 0 : index
    %7 = vector.load %arg6[%c0_4, %c0_5] : memref<8x128xf32, #tpu.memory_space<vmem>>, vector<8x128xf32>
    %8 = vector.shape_cast %6 : vector<8x128xf32> to vector<1x8x128xf32>
    %cst = arith.constant dense<0.000000e+00> : vector<8x128xf32>
    %9 = vector.multi_reduction <add>, %8, %cst [0] : vector<1x8x128xf32> to vector<8x128xf32>
    %10 = arith.addf %7, %9 : vector<8x128xf32>
    %c0_6 = arith.constant 0 : index
    %c0_7 = arith.constant 0 : index
    %11 = vector.load %arg6[%c0_6, %c0_7] : memref<8x128xf32, #tpu.memory_space<vmem>>, vector<8x128xf32>
    tpu.vector_store %arg6[%c0_6, %c0_7], %10 {strides = array<i32>} : memref<8x128xf32, #tpu.memory_space<vmem>>, vector<8x128xf32>,
    %c1_i32 = arith.constant 1 : i32
    %12 = arith.cmpi eq, %arg0, %c1_i32 : i32
    %13 = arith.extui %12 : i1 to i32
    %c0_i32_8 = arith.constant 0 : i32
    %14 = arith.cmpi ne, %13, %c0_i32_8 : i32
    scf.if %14 {
      %c0_9 = arith.constant 0 : index
      %c0_10 = arith.constant 0 : index
      %15 = vector.load %arg6[%c0_9, %c0_10] : memref<8x128xf32, #tpu.memory_space<vmem>>, vector<8x128xf32>
      %16 = vector.shape_cast %15 : vector<8x128xf32> to vector<1x8x128xf32>
      %cst_11 = arith.constant dense<0.000000e+00> : vector<1xf32>
      %17 = vector.multi_reduction <add>, %16, %cst_11 [1, 2] : vector<1x8x128xf32> to vector<1xf32>
      %18 = vector.shape_cast %17 : vector<1xf32> to vector<1x1x1xf32>
      %19 = vector.extract %18[0, 0, 0] : f32 from vector<1x1x1xf32>
      %cst_12 = arith.constant 4.8828125E-4 : f32
      %20 = arith.mulf %19, %cst_12 : f32
      %c0_13 = arith.constant 0 : index
      %c0_14 = arith.constant 0 : index
      %21 = vector.load %arg3[%c0_13, %c0_14] : memref<2x4xf32, #tpu.memory_space<vmem>>, vector<2x4xf32>
      %cst_15 = arith.constant dense<0xFF800000> : vector<2xf32>
      %22 = vector.multi_reduction <maximumf>, %21, %cst_15 [1] : vector<2x4xf32> to vector<2xf32>
      %23 = vector.shape_cast %22 : vector<2xf32> to vector<2x1xf32>
      %24 = vector.broadcast %23 : vector<2x1xf32> to vector<2x4xf32>
      %25 = arith.subf %21, %24 : vector<2x4xf32>
      %26 = math.exp %25 : vector<2x4xf32>
      %cst_16 = arith.constant dense<0.000000e+00> : vector<2xf32>
      %27 = vector.multi_reduction <add>, %26, %cst_16 [1] : vector<2x4xf32> to vector<2xf32>
      %28 = vector.shape_cast %27 : vector<2xf32> to vector<2x1xf32>
      %29 = math.log %28 : vector<2x1xf32>
      %30 = arith.addf %29, %23 : vector<2x1xf32>
      %31 = tpu.iota {dimensions = array<i32: 1>} : vector<2x4xi32>
      %c0_17 = arith.constant 0 : index
      %c0_18 = arith.constant 0 : index
      %32 = vector.load %arg4[%c0_17, %c0_18] : memref<2x1xi32, #tpu.memory_space<vmem>>, vector<2x1xi32>
      %33 = vector.broadcast %32 : vector<2x1xi32> to vector<2x4xi32>
      %34 = arith.cmpi eq, %31, %33 : vector<2x4xi32>
      %cst_19 = arith.constant 0.000000e+00 : f32
      %35 = vector.broadcast %cst_19 : f32 to vector<2x4xf32>
      %36 = arith.select %34, %21, %35 : vector<2x4xi1>, vector<2x4xf32>
      %37 = vector.shape_cast %36 : vector<2x4xf32> to vector<1x2x4xf32>
      %cst_20 = arith.constant dense<0.000000e+00> : vector<1xf32>
      %38 = vector.multi_reduction <add>, %37, %cst_20 [1, 2] : vector<1x2x4xf32> to vector<1xf32>
      %39 = vector.shape_cast %38 : vector<1xf32> to vector<1x1x1xf32>
      %40 = vector.extract %39[0, 0, 0] : f32 from vector<1x1x1xf32>
      %41 = vector.shape_cast %30 : vector<2x1xf32> to vector<1x2x1xf32>
      %cst_21 = arith.constant dense<0.000000e+00> : vector<1xf32>
      %42 = vector.multi_reduction <add>, %41, %cst_21 [1, 2] : vector<1x2x1xf32> to vector<1xf32>
      %43 = vector.shape_cast %42 : vector<1xf32> to vector<1x1x1xf32>
      %44 = vector.extract %43[0, 0, 0] : f32 from vector<1x1x1xf32>
      %45 = arith.subf %44, %40 : f32
      %cst_22 = arith.constant 5.000000e-01 : f32
      %46 = arith.mulf %45, %cst_22 : f32
      %cst_23 = arith.constant 5.000000e-01 : f32
      %47 = arith.mulf %cst_23, %20 : f32
      %48 = arith.addf %47, %46 : f32
      %c0_24 = arith.constant 0 : index
      %49 = memref.load %arg5[%c0_24] : memref<3xf32, #tpu.memory_space<smem>>
      memref.store %48, %arg5[%c0_24] : memref<3xf32, #tpu.memory_space<smem>>
      %c1 = arith.constant 1 : index
      %50 = memref.load %arg5[%c1] : memref<3xf32, #tpu.memory_space<smem>>
      memref.store %20, %arg5[%c1] : memref<3xf32, #tpu.memory_space<smem>>
      %c2 = arith.constant 2 : index
      %51 = memref.load %arg5[%c2] : memref<3xf32, #tpu.memory_space<smem>>
      memref.store %46, %arg5[%c2] : memref<3xf32, #tpu.memory_space<smem>>
    } else {
    }
    return
  }
  func.func @transform_0(%arg0: i32) -> (i32, i32) {
    %c0_i32 = arith.constant 0 : i32
    %c0_i32_0 = arith.constant 0 : i32
    return %arg0, %c0_i32 : i32, i32
  }
  func.func @transform_1(%arg0: i32) -> (i32, i32) {
    %c0_i32 = arith.constant 0 : i32
    %c0_i32_0 = arith.constant 0 : i32
    return %arg0, %c0_i32 : i32, i32
  }
  func.func @transform_2(%arg0: i32) -> (i32, i32) {
    %c0_i32 = arith.constant 0 : i32
    %c0_i32_0 = arith.constant 0 : i32
    %c0_i32_1 = arith.constant 0 : i32
    return %c0_i32, %c0_i32_0 : i32, i32
  }
  func.func @transform_3(%arg0: i32) -> (i32, i32) {
    %c0_i32 = arith.constant 0 : i32
    %c0_i32_0 = arith.constant 0 : i32
    %c0_i32_1 = arith.constant 0 : i32
    return %c0_i32, %c0_i32_0 : i32, i32
  }
  func.func @transform_4(%arg0: i32) -> i32 {
    %c0_i32 = arith.constant 0 : i32
    %c0_i32_0 = arith.constant 0 : i32
    return %c0_i32 : i32
  }
}

</mosaic_0001>

<bundles_post_ra>
// kernel: joint_loss_forward.1
= control target key start
LH: loop header
LB: loop body
LE: loop exit
PB: predicated region body
PF: predicated region fallthrough
CT: control target
= control target key end

     0   :  { %9 = vsyncpa [#allocation4], 0  ;;  %s433_s15 = smov 0   ;;  %s477_s0 = inlined_call_operand.vmem [shape: f32[16,128], index: 0, kind: input, shape index: {}]   ;;  %s478_s1 = inlined_call_operand.vmem [shape: f32[16,128], index: 1, kind: input, shape index: {}]   ;;  %s479_s2 = inlined_call_operand.vmem [shape: f32[2,4], index: 2, kind: input, shape index: {}]   ;;  %s480_s3 = inlined_call_operand.vmem [shape: s32[2,1], index: 3, kind: input, shape index: {}]   ;;  %s481_s4 = inlined_call_operand.vmem [shape: f32[3], index: 4, kind: output, shape index: {}]  }
   0x1 LB: > { %s439_s16 = sadd.s32 4294967295, %s403_s15   ;;  %p341_p0 = scmp.ge.s32.totalorder %s403_s15, 1  ;;  %s403_s15 = sphi %s433_s15, %s15_s15  }
   0x2   : > { %p166_p1 = scmp.lt.s32.totalorder %s403_s15, 3 }
   0x4   : > { %p167_p2 = pnand %p341_p0, %p166_p1 }
   0x5   : > { %p190_p3 = scmp.lt.s32.totalorder (!%p167_p2), %s439_s16, 1  ;;  %p344_p4 = scmp.ne.s32.totalorder (!%p167_p2), %s439_s16, 0 }
   0x6   : > { %170 = sbr.rel (%p167_p2) target bundleno = 569 (0x239), region = 36 }
   0xd   : > { %s191_s17 = scalar_select %p190_p3, %s439_s16, 1 }
   0xe   : > { %201 = sbr.rel (%p344_p4) target bundleno = 21 (0x15), region = 40  ;;  %v405_v0 = vmov (!%p344_p4), 0.0  }
   0xf   : > { %s342_s18 = sshll.u32 %s191_s17, 3  ;;  %202 = vst [vmem:[#allocation2] sm:$0xff] (!%p344_p4), %v405_v0 }
  0x10   : > { %s193_s21 = scalar_lea.vmem %s477_s0, %s342_s18  ;;  %s197_s24 = scalar_lea.vmem %s478_s1, %s342_s18 }
  0x15 PF: > { %v203_v1 = vld [vmem:[%s193_s21] sm:$0xff]  ;;  %p345_p5 = scmp.ne.s32.totalorder %s439_s16, 1 }
  0x16   : > { %v204_v2 = vld [vmem:[%s197_s24] sm:$0xff]  ;;  %vm227_vm0 = vcmask (!%p345_p5), 25600   ;;  %v406_v10 = vmov (!%p345_p5), 0   ;;  %v240_v16 = vlaneseq (!%p345_p5)  ;;  %vm258_vm2 = vcmask (!%p345_p5), 1024  }
  0x17   : > { %v205_v3 = vsub.f32 %v203_v1, %v204_v2  ;;  %v207_v4 = vld [vmem:[#allocation2] sm:$0xff]  ;;  %214 = sbr.rel (%p345_p5) target bundleno = 553 (0x229), region = 44  ;;  %373 = vset.pattern.permute.xlu1 (!%p345_p5), %v406_v10  ;;  %374 = vset.pattern.permute.xlu0 (!%p345_p5), %v406_v10 }
  0x18   : > { %v226_v7 = vld [vmem:[%s479_s2] sm:$0x3] (!%p345_p5)  ;;  %v241_v17 = vand.u32 (!%p345_p5), 127, %v240_v16 }
  0x19   : > { %v206_v5 = vmul.f32 %v205_v3, %v205_v3  ;;  %v228_v8 = vsel (!%p345_p5), %vm227_vm0, %v226_v7, -inf  ;;  %v242_v9 = vld [vmem:[%s480_s3] sm:$0x3] (!%p345_p5) }
  0x1a   : > { %229 = vmax.xlane.f32.xlu0 (!%p345_p5), %v228_v8  ;;  %244 = vperm.xlu1 (!%p345_p5), %373, %v242_v9  }
  0x1b   : > { %v209_v6 = vadd.f32 %v207_v4, %v206_v5 }
  0x1d   : > { %210 = vst [vmem:[#allocation2] sm:$0xff] %v209_v6 }
  0x24   : > { %v215_v21 = vld [vmem:[#allocation2] sm:$0xff] }
  0x3e   : > { %216 = vadd.xlane.f32.xlu1 %v215_v21 }
  0x99   : > { %v245_v18 = vpop.permute.xlu1 %244 }
  0x9a   : > { %vm246_vm1 = vcmp.eq.s32.totalorder %v241_v17, %v245_v18 }
  0x9b   : > { %v247_v19 = vsel %vm246_vm1, %v226_v7, 0.0 }
  0x9c   : > { %v248_v20 = vsel %vm227_vm0, %v247_v19, 0.0 }
  0xa7   : > { %v230_v11 = vpop.xlane.xlu0 %229 }
  0xa8   : > { %v231_v12 = vsub.f32 %v226_v7, %v230_v11 }
  0xaa   : > { %v232_v13 = vmul.f32 1.442695, %v231_v12 }
  0xac   : > { %375 = vpow2.f32 %v232_v13 }
  0xb6   : > { %v376_v14 = vpop.eup %375 }
  0xb7   : > { %v234_v15 = vsel %vm227_vm0, %v376_v14, 0.0 }
  0xb8   : > { %235 = vadd.xlane.f32.xlu0 %v234_v15 }
  0xbc   : > { %249 = vadd.xlane.f32.xlu0 %v248_v20 }
  0xcb   : > { %v217_v28 = vpop.xlane.xlu1 %216 }
  0xcc   : > { %v218_v30 = vrot.slane %v217_v28, 4 }
  0xce   : > { %v219_v32 = vadd.f32 %v218_v30, %v217_v28 }
  0xd0   : > { %v220_v34 = vrot.slane %v219_v32, 2 }
  0xd2   : > { %v221_v35 = vadd.f32 %v220_v34, %v219_v32 }
  0xd4   : > { %v222_v37 = vrot.slane %v221_v35, 1 }
  0xd6   : > { %v223_v39 = vadd.f32 %v222_v37, %v221_v35 }
  0xd8   : > { %350 = vpush %v223_v39 }
 0x109   : > { %s351_s29 = spop %350 }
 0x10a   : > { %s225_s30 = smul.f32 0.00048828125, %s351_s29 }
 0x10c   : > { %276 = sst [smem:[#allocation3 + $0x1]] %s225_s30  ;;  %s271_s8 = smul.f32 0.5, %s225_s30 }
 0x145   : > { %v236_v22 = vpop.xlane.xlu0 %235 }
 0x146   : > { %377 = vlog2.f32 %v236_v22 }
 0x149   : > { %v250_v27 = vpop.xlane.xlu0 %249 }
 0x14a   : > { %v251_v29 = vrot.slane %v250_v27, 4 }
 0x14c   : > { %v252_v31 = vadd.f32 %v251_v29, %v250_v27 }
 0x14e   : > { %v253_v33 = vrot.slane %v252_v31, 2 }
 0x150   : > { %v378_v23 = vpop.eup %377  ;;  %v254_v36 = vadd.f32 %v253_v33, %v252_v31 }
 0x151   : > { %v238_v24 = vmul.f32 0.6931472, %v378_v23 }
 0x152   : > { %v255_v38 = vrot.slane %v254_v36, 1 }
 0x153   : > { %v239_v25 = vadd.f32 %v238_v24, %v230_v11 }
 0x154   : > { %v256_v40 = vadd.f32 %v255_v38, %v254_v36 }
 0x155   : > { %v259_v26 = vsel %vm258_vm2, %v239_v25, 0.0 }
 0x156   : > { %260 = vadd.xlane.f32.xlu0 %v259_v26  ;;  %352 = vpush %v256_v40 }
 0x187   : > { %s353_s5 = spop %352 }
 0x1e3   : > { %v261_v41 = vpop.xlane.xlu0 %260 }
 0x1e4   : > { %v262_v42 = vrot.slane %v261_v41, 4 }
 0x1e6   : > { %v263_v43 = vadd.f32 %v262_v42, %v261_v41 }
 0x1e8   : > { %v264_v44 = vrot.slane %v263_v43, 2 }
 0x1ea   : > { %v265_v45 = vadd.f32 %v264_v44, %v263_v43 }
 0x1ec   : > { %v266_v46 = vrot.slane %v265_v45, 1 }
 0x1ee   : > { %v267_v47 = vadd.f32 %v266_v46, %v265_v45 }
 0x1f0   : > { %354 = vpush %v267_v47 }
 0x221   : > { %s355_s6 = spop %354 }
 0x222   : > { %s269_s7 = ssub.f32 %s355_s6, %s353_s5 }
 0x224   : > { %s270_s9 = smul.f32 0.5, %s269_s7 }
 0x226   : > { %s272_s10 = sadd.f32 %s271_s8, %s270_s9 }
 0x227   : > { %278 = sst [smem:[#allocation3 + $0x2]] %s270_s9 }
 0x228   : > { %274 = sst [smem:[#allocation3]] %s272_s10 }
 0x229 PF: > { %p360_p6 = scmp.eq.s32.totalorder %s439_s16, 1  ;;  %s286_s13 = sshll.u32 %s481_s4, 4  ;;  %s287_s13 = int_to_ptr.vmem [resolvable:$true] %s286_s13 }
 0x22a   : > { %s379_s14 = scalar_lea.vmem %s287_s13, 16  ;;  %p386_p10 = scmp.lt.s32.totalorder %s287_s13, %s287_s13 }
 0x22b   : > { %p380_p7 = scmp.ne.s32.totalorder %s287_s13, %s379_s14  ;;  %p387_p11 = scmp.lt.s32.totalorder %s379_s14, %s379_s14 }
 0x22d   : > { %p381_p8 = pnand %p380_p7, %p360_p6  ;;  %p388_p12 = por %p387_p11, %p386_p10 }
 0x22f   : > { %p382_p9 = pneg %p381_p8 }
 0x231   : > { %p389_p13 = pnand %p388_p12, %p382_p9 }
 0x233   : > { %392 = shalt.err (!%p389_p13)
}
 0x234   : > { %s407_s17 = smov [#allocation3]  }
 0x235   : > { %357 = dma.smem_to_vmem (%p360_p6), %s407_s17, 16, %s287_s13, [#allocation4]  }
 0x236   : > { %398 = dma.done.wait (%p360_p6), [#allocation4], 16  }
 0x237   : > { %400 = vsyncadd (%p360_p6), [#allocation4], 4294967280 }
 0x238   : > { %294 = sfence }
 0x239 PF: > { %s15_s15 = sadd.s32 1, %s403_s15  }
 0x23a   : > { %p12_p0 = scmp.ge.s32.totalorder %s15_s15, 4  }
 0x23c   :  { %14 = sbr.rel (!%p12_p0) target bundleno = 1 (0x1), region = 77 }
 0x243   :  { %300 = vsyncpa [#allocation4], 1 }
 0x244   :  { %302 = vsyncpa [#allocation4 + $0x1], 1 }

</bundles_post_ra>
